<compile_context>
chip_gen: v7x
topology: tpu7x:2x2x1
jax: 0.10.0
libtpu: 0.0.40
codegen_flags: <defaults>
</compile_context>

<pallas_src>
import jax
import jax.numpy as jnp
from jax.experimental import pallas as pl
from jax.experimental.pallas import tpu as pltpu


_LANE = 1024                  # last-dim width: multiple of 128 -> lane-dense tiles
_MAX_TILE_ROWS = 1024         # (1024, 1024) f32 tile = 4 MiB per pipeline buffer
_MIN_GRID_STEPS = 4           # keep >=4 grid steps so double-buffering overlaps
_MIN_PALLAS_ELEMS = 1 << 18   # ~256K elements: kernel-path crossover
_VMEM_LIMIT_BYTES = 40 << 20  # explicit scoped VMEM: >16 MiB resident tiles OK on
                              # v5e, still < v7x's 64 MiB physical


def _affine_kernel(params_ref, x_ref, o_ref):
    # params_ref: (2,) f32 SMEM holding [w, b]; x_ref/o_ref: (tile_rows, _LANE) tiles.
    w = params_ref[0]  # scalar reads hoisted once per grid step
    b = params_ref[1]
    o_ref[...] = (x_ref[...] * w + b).astype(o_ref.dtype)


def _round_up(a, m):
    return ((a + m - 1) // m) * m


def _sublane(dtype):
    # Minimum sublane multiple for the block shape by element size.
    return {4: 8, 2: 16, 1: 32}.get(jnp.dtype(dtype).itemsize, 8)


def _affine_2d(x2d, params, tile_rows):
    rows, lane = x2d.shape
    grid = (pl.cdiv(rows, tile_rows),)  # partial last block overhangs -> handled by Pallas
    return pl.pallas_call(
        _affine_kernel,
        out_shape=jax.ShapeDtypeStruct((rows, lane), x2d.dtype),
        grid=grid,
        in_specs=[
            pl.BlockSpec(memory_space=pltpu.SMEM),              # [w, b] scalars
            pl.BlockSpec((tile_rows, lane), lambda i: (i, 0)),  # x row-tile
        ],
        out_specs=pl.BlockSpec((tile_rows, lane), lambda i: (i, 0)),
        compiler_params=pltpu.CompilerParams(
            dimension_semantics=("parallel",),   # shard the row loop across TCs on v7x
            vmem_limit_bytes=_VMEM_LIMIT_BYTES,
        ),
    )(params, x2d)


def regression_forward(x, w, b, *, min_pallas_elems=_MIN_PALLAS_ELEMS):
    """y = w * x + b via a tiled, pipelined Pallas TPU kernel.

    x: any-shape array (the PyTorch module is elementwise).
    w, b: (1,)-shaped float32 parameters (as in nn.Parameter(torch.rand(1))).
    """
    orig_shape = x.shape
    orig_dtype = x.dtype
    xf = x.reshape(-1)
    n = xf.shape[0]

    # Tiny inputs: launch + plumbing overhead dwarfs one fused HBM pass in XLA.
    if n < min_pallas_elems:
        return (xf * w[0] + b[0]).astype(orig_dtype).reshape(orig_shape)

    params = jnp.stack([w[0], b[0]]).astype(jnp.float32)

    lane = _LANE
    sub = _sublane(orig_dtype)

    n_bulk = (n // lane) * lane   # lane-aligned bulk handled by the kernel
    tail_len = n - n_bulk
    rows = n_bulk // lane

    # Largest sublane-aligned tile <= _MAX_TILE_ROWS that still yields >= 4 grid steps.
    tile_rows = min(_MAX_TILE_ROWS, _round_up(pl.cdiv(rows, _MIN_GRID_STEPS), sub))
    tile_rows = max(tile_rows, sub)

    bulk = xf if tail_len == 0 else xf[:n_bulk]
    x2d = bulk.reshape(rows, lane)  # contiguous reshape: no data movement

    out_flat = _affine_2d(x2d, params, tile_rows).reshape(-1)

    if tail_len:
        # <1024-element ragged tail: plain JAX, then concatenate with the bulk.
        tail_out = (xf[n_bulk:] * w[0] + b[0]).astype(orig_dtype)
        out_flat = jnp.concatenate([out_flat, tail_out])

    return out_flat.reshape(orig_shape)


if __name__ == "__main__":
    # Deterministic parameter init mimicking torch.rand(1) for w and b.
    key = jax.random.PRNGKey(0)
    kw, kb, kx1, kx2 = jax.random.split(key, 4)
    w = jax.random.uniform(kw, (1,), dtype=jnp.float32)
    b = jax.random.uniform(kb, (1,), dtype=jnp.float32)

    # (1) The original 5-element demo from the PyTorch spec (tiny-input fast path).
    x_demo = jnp.array([5.0, 7.0, 12.0, 16.0, 20.0], dtype=jnp.float32)
    y_demo = jax.block_until_ready(regression_forward(x_demo, w, b))
    assert y_demo.shape == x_demo.shape
    assert jnp.allclose(y_demo, w[0] * x_demo + b[0], rtol=1e-6, atol=1e-6)

    # (2) Lane-aligned input -> zero-copy Pallas path (256 rows x 1024 lanes, grid=(4,)).
    x_aligned = jax.random.uniform(kx1, (256, 1024), dtype=jnp.float32)
    y_aligned = jax.block_until_ready(regression_forward(x_aligned, w, b))
    assert y_aligned.shape == x_aligned.shape
    assert jnp.allclose(y_aligned, w[0] * x_aligned + b[0], rtol=1e-6, atol=1e-6)

    # (3) Ragged length (600_000) -> kernel on the 585-row bulk + plain-JAX tail.
    x_ragged = jax.random.uniform(kx2, (600_000,), dtype=jnp.float32)
    y_ragged = jax.block_until_ready(regression_forward(x_ragged, w, b))
    assert y_ragged.shape == x_ragged.shape
    assert jnp.allclose(y_ragged, w[0] * x_ragged + b[0], rtol=1e-6, atol=1e-6)

    print("KERNEL_OK")
</pallas_src>

<mosaic_0001>
module attributes {stable_mosaic.version = 11 : i64} {
  func.func @_affine_kernel(%arg0: i32, %arg1: memref<2xf32, #tpu.memory_space<smem>>, %arg2: memref<64x1024xf32, #tpu.memory_space<vmem>>, %arg3: memref<64x1024xf32, #tpu.memory_space<vmem>>) attributes {dimension_semantics = [#tpu.dimension_semantics<parallel>], iteration_bounds = array<i64: 4>, scalar_prefetch = 0 : i64, scratch_operands = 0 : i64, tpu.core_type = #tpu.core_type<tc>, window_params = [{transform_indices = @transform_0, window_bounds = array<i64: 2>}, {transform_indices = @transform_1, window_bounds = array<i64: 64, 1024>}, {transform_indices = @transform_2, window_bounds = array<i64: 64, 1024>}]} {
    %c0 = arith.constant 0 : index
    %0 = memref.load %arg1[%c0] : memref<2xf32, #tpu.memory_space<smem>>
    %c1 = arith.constant 1 : index
    %1 = memref.load %arg1[%c1] : memref<2xf32, #tpu.memory_space<smem>>
    %c0_0 = arith.constant 0 : index
    %c0_1 = arith.constant 0 : index
    %2 = vector.load %arg2[%c0_0, %c0_1] : memref<64x1024xf32, #tpu.memory_space<vmem>>, vector<64x1024xf32>
    %3 = vector.broadcast %0 : f32 to vector<64x1024xf32>
    %4 = arith.mulf %2, %3 : vector<64x1024xf32>
    %5 = vector.broadcast %1 : f32 to vector<64x1024xf32>
    %6 = arith.addf %4, %5 : vector<64x1024xf32>
    %c0_2 = arith.constant 0 : index
    %c0_3 = arith.constant 0 : index
    %7 = vector.load %arg3[%c0_2, %c0_3] : memref<64x1024xf32, #tpu.memory_space<vmem>>, vector<64x1024xf32>
    tpu.vector_store %arg3[%c0_2, %c0_3], %6 {strides = array<i32>} : memref<64x1024xf32, #tpu.memory_space<vmem>>, vector<64x1024xf32>,
    return
  }
  func.func @transform_0(%arg0: i32) -> i32 {
    %c0_i32 = arith.constant 0 : i32
    %c0_i32_0 = arith.constant 0 : i32
    return %c0_i32 : i32
  }
  func.func @transform_1(%arg0: i32) -> (i32, i32) {
    %c0_i32 = arith.constant 0 : i32
    %c0_i32_0 = arith.constant 0 : i32
    return %arg0, %c0_i32 : i32, i32
  }
  func.func @transform_2(%arg0: i32) -> (i32, i32) {
    %c0_i32 = arith.constant 0 : i32
    %c0_i32_0 = arith.constant 0 : i32
    return %arg0, %c0_i32 : i32, i32
  }
}

</mosaic_0001>

<bundles_post_ra>
// kernel: tpu_custom_call.1
= control target key start
LH: loop header
LB: loop body
LE: loop exit
PB: predicated region body
PF: predicated region fallthrough
CT: control target
= control target key end

     0   :  { %7 = vsyncpa [#allocation5], 0  ;;  %s1215_s0 = inlined_call_operand.hbm [shape: f32[2], index: 0, kind: input, shape index: {}]   ;;  %s1216_s1 = inlined_call_operand.hbm [shape: f32[256,1024], index: 1, kind: input, shape index: {}]   ;;  %s1217_s2 = inlined_call_operand.hbm [shape: f32[256,1024], index: 2, kind: output, shape index: {}]  }
   0x1   :  { %8 = vsyncpa [#allocation3], 0 }
   0x2   :  { %10 = vsyncpa [#allocation3 + $0x1], 0 }
   0x3   :  { %11 = vsyncpa [#allocation4], 0 }
   0x4   :  { %13 = vsyncpa [#allocation4 + $0x1], 0  ;;  %s758_s9 = smov 0   ;;  %s760_s10 = smov 0  }
   0x5   :  { %s762_s11 = smov 0   ;;  %s764_s12 = smov 0  }
   0x6 LB: > { %s779_s13 = sadd.s32 4294967295, %s734_s12   ;;  %s537_s14 = sadd.s32 4294967294, %s734_s12   ;;  %s734_s12 = sphi %s764_s12, %s1235_s12   ;;  %s730_s11 = sphi %s762_s11, %s1234_s11   ;;  %s726_s10 = sphi %s760_s10, %s1233_s10   ;;  %s722_s9 = sphi %s758_s9, %s1232_s9  }
   0x7   : > { %s783_s15 = sadd.s32 1, %s734_s12   ;;  %s47_s16 = sadd.s32 1, %s730_s11 }
   0x8   : > { %s44_s17 = ssub.s32 %s734_s12, %s783_s15  ;;  %p54_p0 = scmp.ne.s32.totalorder %s730_s11, %s726_s10 }
   0x9   : > { %p45_p1 = scmp.eq.s32.totalorder %s44_s17, 0  ;;  %p55_p2 = scmp.eq.s32.totalorder %s734_s12, 0 }
   0xa   : > { %p60_p3 = scmp.ne.s32.totalorder %s726_s10, %s722_s9  ;;  %p1219_p4 = scmp.eq.s32.totalorder %s779_s13, 0 }
   0xb   : > { %s795_s18 = scalar_select %p45_p1, %s730_s11, %s47_s16  }
   0xc   : > { %p797_p5 = por %p55_p2, %p54_p0  ;;  %p803_p6 = por %p1219_p4, %p60_p3 }
   0xd   : > { %p84_p7 = scmp.eq.s32.totalorder %s779_s13, 3  ;;  %p90_p8 = scmp.eq.s32.totalorder %s537_s14, 3 }
   0xe   : > { %s1222_s20 = scalar_select %p803_p6, 1, 0 }
   0xf   : > { %p538_p9 = scmp.ge.s32.totalorder %s734_s12, 1  ;;  %p97_p10 = scmp.lt.s32.totalorder %s734_s12, 5 }
  0x10   : > { %p810_p11 = por %p84_p7, %p54_p0  ;;  %p814_p12 = por %p90_p8, %p60_p3 }
  0x11   : > { %p818_p13 = pnand %p538_p9, %p97_p10  ;;  %p581_p2 = scmp.lt.s32.totalorder %s734_s12, 4 }
  0x12   : > { %s1223_s21 = scalar_select %p810_p11, 1, 0 }
  0x13   : > { %s1224_s22 = scalar_select %p814_p12, 1, 0 }
  0x14   : > { %p568_p1 = pneg %p818_p13  ;;  %s119_s24 = sand.u32 1, %s730_s11  }
  0x15   : > { %s557_s25 = sshll.u32 %s734_s12, 13  ;;  %p831_p0 = pnand %p581_p2, %p797_p5 }
  0x16   : > { %p569_p6 = pnand %p568_p1, %p1219_p4  ;;  %s541_s27 = sshll.u32 %s119_s24, 9 }
  0x17   : > { %s621_s30 = scalar_lea.hbm %s1215_s0, 16 }
  0x18   : > { %p622_p3 = scmp.ne.s32.totalorder %s1215_s0, %s621_s30  ;;  %p623_p7 = pneg %p569_p6 }
  0x19   : > { %p628_p10 = scmp.lt.u32.totalorder %s621_s30, %s1215_s0 }
  0x1a   : > { %p624_p8 = pnand %p623_p7, %p622_p3 }
  0x1c   : > { %p625_p9 = pneg %p624_p8 }
  0x1e   : > { %p630_p5 = pnand %p628_p10, %p625_p9 }
  0x20   : > { %633 = shalt.err (!%p630_p5)
}
  0x21   : > { %s736_s7 = smov [#allocation2]   ;;  %s850_s19 = scalar_lea.hbm %s1216_s1, %s557_s25 }
  0x22   : > { %571 = dma.hbm_to_smem (!%p569_p6), %s1215_s0, 16, %s736_s7, [#allocation5]  }
  0x23   : > { %s123_s28 = scalar_lea.vmem [#allocation6], %s541_s27  ;;  %s854_s30 = scalar_lea.sflag [#allocation3], %s119_s24 }
  0x24   : > { %s131_s29 = sshll.u32 %s123_s28, 4  ;;  %s634_s3 = scalar_lea.hbm %s850_s19, 8192  ;;  %s852_s29 = int_to_ptr.vmem [resolvable:$true] %s131_s29 }
  0x25   : > { %p635_p1 = scmp.ne.s32.totalorder %s850_s19, %s634_s3  ;;  %p636_p2 = pneg %p831_p0 }
  0x26   : > { %s639_s5 = scalar_lea.hbm %s1216_s1, 32768  ;;  %p640_p7 = scmp.lt.u32.totalorder %s850_s19, %s1216_s1 }
  0x27   : > { %p637_p6 = pnand %p636_p2, %p635_p1  ;;  %p641_p8 = scmp.lt.u32.totalorder %s639_s5, %s634_s3 }
  0x28   : > { %p643_p10 = scmp.lt.u32.totalorder %s634_s3, %s850_s19 }
  0x29   : > { %p638_p3 = pneg %p637_p6  ;;  %p642_p9 = por %p641_p8, %p640_p7 }
  0x2b   : > { %p644_p5 = por %p643_p10, %p642_p9 }
  0x2d   : > { %p645_p4 = pnand %p644_p5, %p638_p3 }
  0x2f   : > { %648 = shalt.err (!%p645_p4)
}
  0x30   : > { %s649_s24 = scalar_lea.vmem %s852_s29, 8192  ;;  %s737_s27 = smov [#allocation6]  }
  0x31   : > { %p650_p1 = scmp.ne.s32.totalorder %s852_s29, %s649_s24  ;;  %s654_s8 = sshll.u32 %s737_s27, 4  ;;  %s655_s8 = int_to_ptr.vmem [resolvable:$false] %s654_s8 }
  0x32   : > { %s656_s14 = scalar_lea.vmem %s655_s8, 16384  ;;  %p657_p11 = scmp.lt.s32.totalorder %s852_s29, %s655_s8 }
  0x33   : > { %p652_p6 = pnand %p650_p1, %p636_p2  ;;  %p658_p7 = scmp.lt.s32.totalorder %s656_s14, %s649_s24 }
  0x35   : > { %p653_p12 = pneg %p652_p6  ;;  %p659_p8 = por %p658_p7, %p657_p11 }
  0x37   : > { %p660_p9 = pnand %p659_p8, %p653_p12 }
  0x39   : > { %663 = shalt.err (!%p660_p9)
}
  0x3a   : > { %s738_s16 = smov 1024   ;;  %s739_s17 = smov 64  }
  0x3b   : > { %575 = dma.hbm_to_vmem [thread:$0]  (!%p831_p0), %s850_s19, 8192, %s852_s29, %s854_s30, %s738_s16, %s738_s16, %s739_s17  }
  0x3c   : > { %143 = sbr.rel (%p818_p13) target bundleno = 137 (0x89), region = 28  ;;  %p1227_p4 = scmp.eq.s32.totalorder (!%p818_p13), %s779_s13, 0 }
  0x43   : > { %709 = dma.done.wait (%p1227_p4), [#allocation5], 16   ;;  %p1228_p2 = pmov %p1227_p4 }
  0x44   : > { %s889_s28 = sand.u32 1, %s726_s10   ;;  %p1229_p11 = scmp.ne.s32.totalorder %s1222_s20, 0 }
  0x45   : > { %711 = vsyncadd (%p1228_p2), [#allocation5], 4294967280  ;;  %s547_s3 = sshll.u32 %s889_s28, 9  ;;  %s150_s25 = scalar_lea.sflag [#allocation3], %s889_s28 }
  0x46   : > { %s895_s26 = scalar_lea.vmem [#allocation6], %s547_s3 }
  0x47   : > { %713 = dma.done.wait (%p1229_p11), %s150_s25, 8192  }
  0x48   : > { %715 = vsyncadd (%p1229_p11), %s150_s25, 4294959104 }
  0x49   : > { %158 = sfence }
  0x4a   : > { %s177_s23 = sld [smem:[#allocation2]]  ;;  %s549_s19 = sld [smem:[#allocation2 + $0x1]]  ;;  %v179_v0 = vld [vmem:[%s895_s26] sm:$0xff]  ;;  %v180_v1 = vld [vmem:[%s895_s26 + $0x8] sm:$0xff]  ;;  %v181_v2 = vld [vmem:[%s895_s26 + $0x10] sm:$0xff] }
  0x4b   : > { %v182_v3 = vld [vmem:[%s895_s26 + $0x18] sm:$0xff]  ;;  %v183_v4 = vld [vmem:[%s895_s26 + $0x20] sm:$0xff]  ;;  %v184_v5 = vld [vmem:[%s895_s26 + $0x28] sm:$0xff]  ;;  %s938_s20 = scalar_lea.vmem [#allocation7], %s547_s3  ;;  %s559_s29 = sshll.u32 %s779_s13, 13 }
  0x4c   : > { %v185_v6 = vld [vmem:[%s895_s26 + $0x30] sm:$0xff]  ;;  %v186_v8 = vld [vmem:[%s895_s26 + $0x38] sm:$0xff]  ;;  %v187_v13 = vld [vmem:[%s895_s26 + $0x40] sm:$0xff]  ;;  %s452_s30 = sshll.u32 %s938_s20, 4  ;;  %s1161_s5 = scalar_lea.hbm %s1217_s2, %s559_s29  ;;  %s1163_s30 = int_to_ptr.vmem [resolvable:$true] %s452_s30 }
  0x4d   : > { %v188_v18 = vld [vmem:[%s895_s26 + $0x48] sm:$0xff]  ;;  %v189_v19 = vld [vmem:[%s895_s26 + $0x50] sm:$0xff]  ;;  %v190_v20 = vld [vmem:[%s895_s26 + $0x58] sm:$0xff]  ;;  %s438_s6 = scalar_lea.sflag [#allocation4], %s889_s28  ;;  %s664_s7 = scalar_lea.vmem %s1163_s30, 8192 }
  0x4e   : > { %v191_v25 = vld [vmem:[%s895_s26 + $0x60] sm:$0xff]  ;;  %v192_v26 = vld [vmem:[%s895_s26 + $0x68] sm:$0xff]  ;;  %v193_v27 = vld [vmem:[%s895_s26 + $0x70] sm:$0xff]  ;;  %p665_p12 = scmp.ne.s32.totalorder %s1163_s30, %s664_s7  ;;  %p1230_p13 = scmp.ne.s32.totalorder %s1223_s21, 0 }
  0x4f   : > { %v194_v32 = vld [vmem:[%s895_s26 + $0x78] sm:$0xff]  ;;  %v195_v37 = vld [vmem:[%s895_s26 + $0x80] sm:$0xff]  ;;  %v196_v42 = vld [vmem:[%s895_s26 + $0x88] sm:$0xff]  ;;  %s740_s24 = smov [#allocation7]  }
  0x50   : > { %v908_v7 = vstv %s177_s23  ;;  %v912_v10 = vstv %s549_s19  ;;  %v197_v43 = vld [vmem:[%s895_s26 + $0x90] sm:$0xff]  ;;  %v198_v44 = vld [vmem:[%s895_s26 + $0x98] sm:$0xff]  ;;  %p666_p0 = pnand %p665_p12, %p1230_p13  ;;  %s668_s27 = sshll.u32 %s740_s24, 4  ;;  %s669_s27 = int_to_ptr.vmem [resolvable:$false] %s668_s27 }
  0x51   : > { %v244_v9 = vmul.f32 %v908_v7, %v179_v0  ;;  %v245_v11 = vmul.f32 %v908_v7, %v180_v1  ;;  %v246_v12 = vmul.f32 %v908_v7, %v181_v2  ;;  %v247_v14 = vmul.f32 %v908_v7, %v182_v3  ;;  %v199_v49 = vld [vmem:[%s895_s26 + $0xa0] sm:$0xff]  ;;  %v200_v50 = vld [vmem:[%s895_s26 + $0xa8] sm:$0xff]  ;;  %v201_v51 = vld [vmem:[%s895_s26 + $0xb0] sm:$0xff]  ;;  %s670_s8 = scalar_lea.vmem %s669_s27, 16384  ;;  %p671_p10 = scmp.lt.s32.totalorder %s1163_s30, %s669_s27 }
  0x52   : > { %v248_v15 = vmul.f32 %v908_v7, %v183_v4  ;;  %v249_v16 = vmul.f32 %v908_v7, %v184_v5  ;;  %v250_v17 = vmul.f32 %v908_v7, %v185_v6  ;;  %v251_v24 = vmul.f32 %v908_v7, %v186_v8  ;;  %v202_v56 = vld [vmem:[%s895_s26 + $0xb8] sm:$0xff]  ;;  %v203_v61 = vld [vmem:[%s895_s26 + $0xc0] sm:$0xff]  ;;  %v204_v2 = vld [vmem:[%s895_s26 + $0xc8] sm:$0xff]  ;;  %p667_p3 = pneg %p666_p0  ;;  %p672_p5 = scmp.lt.s32.totalorder %s670_s8, %s664_s7 }
  0x53   : > { %v309_v21 = vadd.f32 %v912_v10, %v244_v9  ;;  %v310_v22 = vadd.f32 %v912_v10, %v245_v11  ;;  %v311_v23 = vadd.f32 %v912_v10, %v246_v12  ;;  %v312_v28 = vadd.f32 %v912_v10, %v247_v14  ;;  %v205_v3 = vld [vmem:[%s895_s26 + $0xd0] sm:$0xff]  ;;  %v206_v4 = vld [vmem:[%s895_s26 + $0xd8] sm:$0xff]  ;;  %v207_v11 = vld [vmem:[%s895_s26 + $0xe0] sm:$0xff] }
  0x54   : > { %v313_v29 = vadd.f32 %v912_v10, %v248_v15  ;;  %v314_v30 = vadd.f32 %v912_v10, %v249_v16  ;;  %v315_v31 = vadd.f32 %v912_v10, %v250_v17  ;;  %v316_v33 = vadd.f32 %v912_v10, %v251_v24  ;;  %v208_v12 = vld [vmem:[%s895_s26 + $0xe8] sm:$0xff]  ;;  %p673_p1 = por %p672_p5, %p671_p10 }
  0x55   : > { %373 = vst [vmem:[%s938_s20] sm:$0xff] %v309_v21  ;;  %374 = vst [vmem:[%s938_s20 + $0x8] sm:$0xff] %v310_v22  ;;  %v252_v34 = vmul.f32 %v908_v7, %v187_v13  ;;  %v253_v35 = vmul.f32 %v908_v7, %v188_v18  ;;  %v254_v36 = vmul.f32 %v908_v7, %v189_v19  ;;  %v209_v13 = vld [vmem:[%s895_s26 + $0xf0] sm:$0xff]  ;;  %v210_v18 = vld [vmem:[%s895_s26 + $0xf8] sm:$0xff] }
  0x56   : > { %375 = vst [vmem:[%s938_s20 + $0x10] sm:$0xff] %v311_v23  ;;  %376 = vst [vmem:[%s938_s20 + $0x18] sm:$0xff] %v312_v28  ;;  %v255_v38 = vmul.f32 %v908_v7, %v190_v20  ;;  %v256_v39 = vmul.f32 %v908_v7, %v191_v25  ;;  %v257_v40 = vmul.f32 %v908_v7, %v192_v26  ;;  %v211_v23 = vld [vmem:[%s895_s26 + $0x100] sm:$0xff]  ;;  %v212_v28 = vld [vmem:[%s895_s26 + $0x108] sm:$0xff]  ;;  %p674_p6 = pnand %p673_p1, %p667_p3 }
  0x57   : > { %377 = vst [vmem:[%s938_s20 + $0x20] sm:$0xff] %v313_v29  ;;  %378 = vst [vmem:[%s938_s20 + $0x28] sm:$0xff] %v314_v30  ;;  %v258_v41 = vmul.f32 %v908_v7, %v193_v27  ;;  %v317_v45 = vadd.f32 %v912_v10, %v252_v34  ;;  %v318_v46 = vadd.f32 %v912_v10, %v253_v35  ;;  %v213_v29 = vld [vmem:[%s895_s26 + $0x110] sm:$0xff]  ;;  %v214_v30 = vld [vmem:[%s895_s26 + $0x118] sm:$0xff] }
  0x58   : > { %379 = vst [vmem:[%s938_s20 + $0x30] sm:$0xff] %v315_v31  ;;  %380 = vst [vmem:[%s938_s20 + $0x38] sm:$0xff] %v316_v33  ;;  %v319_v47 = vadd.f32 %v912_v10, %v254_v36  ;;  %v259_v48 = vmul.f32 %v908_v7, %v194_v32  ;;  %v320_v52 = vadd.f32 %v912_v10, %v255_v38  ;;  %v215_v35 = vld [vmem:[%s895_s26 + $0x120] sm:$0xff]  ;;  %v216_v36 = vld [vmem:[%s895_s26 + $0x128] sm:$0xff] }
  0x59   : > { %v321_v53 = vadd.f32 %v912_v10, %v256_v39  ;;  %v322_v54 = vadd.f32 %v912_v10, %v257_v40  ;;  %v323_v55 = vadd.f32 %v912_v10, %v258_v41  ;;  %381 = vst [vmem:[%s938_s20 + $0x40] sm:$0xff] %v317_v45  ;;  %382 = vst [vmem:[%s938_s20 + $0x48] sm:$0xff] %v318_v46 }
  0x5a   : > { %383 = vst [vmem:[%s938_s20 + $0x50] sm:$0xff] %v319_v47  ;;  %v324_v57 = vadd.f32 %v912_v10, %v259_v48  ;;  %v260_v58 = vmul.f32 %v908_v7, %v195_v37  ;;  %v261_v59 = vmul.f32 %v908_v7, %v196_v42  ;;  %v262_v60 = vmul.f32 %v908_v7, %v197_v43  ;;  %v217_v37 = vld [vmem:[%s895_s26 + $0x130] sm:$0xff]  ;;  %v218_v42 = vld [vmem:[%s895_s26 + $0x138] sm:$0xff]  ;;  %v219_v47 = vld [vmem:[%s895_s26 + $0x140] sm:$0xff] }
  0x5b   : > { %384 = vst [vmem:[%s938_s20 + $0x58] sm:$0xff] %v320_v52  ;;  %385 = vst [vmem:[%s938_s20 + $0x60] sm:$0xff] %v321_v53  ;;  %v263_v62 = vmul.f32 %v908_v7, %v198_v44  ;;  %v264_v63 = vmul.f32 %v908_v7, %v199_v49  ;;  %v265_v0 = vmul.f32 %v908_v7, %v200_v50  ;;  %v220_v52 = vld [vmem:[%s895_s26 + $0x148] sm:$0xff]  ;;  %v221_v53 = vld [vmem:[%s895_s26 + $0x150] sm:$0xff] }
  0x5c   : > { %386 = vst [vmem:[%s938_s20 + $0x68] sm:$0xff] %v322_v54  ;;  %387 = vst [vmem:[%s938_s20 + $0x70] sm:$0xff] %v323_v55  ;;  %v266_v1 = vmul.f32 %v908_v7, %v201_v51  ;;  %v325_v5 = vadd.f32 %v912_v10, %v260_v58  ;;  %v326_v6 = vadd.f32 %v912_v10, %v261_v59  ;;  %v222_v54 = vld [vmem:[%s895_s26 + $0x158] sm:$0xff]  ;;  %v223_v59 = vld [vmem:[%s895_s26 + $0x160] sm:$0xff] }
  0x5d   : > { %388 = vst [vmem:[%s938_s20 + $0x78] sm:$0xff] %v324_v57  ;;  %v327_v8 = vadd.f32 %v912_v10, %v262_v60  ;;  %v267_v9 = vmul.f32 %v908_v7, %v202_v56  ;;  %v328_v14 = vadd.f32 %v912_v10, %v263_v62  ;;  %v329_v15 = vadd.f32 %v912_v10, %v264_v63  ;;  %v224_v60 = vld [vmem:[%s895_s26 + $0x168] sm:$0xff] }
  0x5e   : > { %v330_v16 = vadd.f32 %v912_v10, %v265_v0  ;;  %v331_v17 = vadd.f32 %v912_v10, %v266_v1  ;;  %389 = vst [vmem:[%s938_s20 + $0x80] sm:$0xff] %v325_v5  ;;  %390 = vst [vmem:[%s938_s20 + $0x88] sm:$0xff] %v326_v6  ;;  %v268_v20 = vmul.f32 %v908_v7, %v203_v61  ;;  %v225_v61 = vld [vmem:[%s895_s26 + $0x170] sm:$0xff] }
  0x5f   : > { %391 = vst [vmem:[%s938_s20 + $0x90] sm:$0xff] %v327_v8  ;;  %v332_v19 = vadd.f32 %v912_v10, %v267_v9  ;;  %v269_v21 = vmul.f32 %v908_v7, %v204_v2  ;;  %v270_v22 = vmul.f32 %v908_v7, %v205_v3  ;;  %392 = vst [vmem:[%s938_s20 + $0x98] sm:$0xff] %v328_v14  ;;  %v226_v2 = vld [vmem:[%s895_s26 + $0x178] sm:$0xff]  ;;  %v227_v8 = vld [vmem:[%s895_s26 + $0x180] sm:$0xff] }
  0x60   : > { %393 = vst [vmem:[%s938_s20 + $0xa0] sm:$0xff] %v329_v15  ;;  %394 = vst [vmem:[%s938_s20 + $0xa8] sm:$0xff] %v330_v16  ;;  %v271_v24 = vmul.f32 %v908_v7, %v206_v4  ;;  %v272_v25 = vmul.f32 %v908_v7, %v207_v11  ;;  %v273_v26 = vmul.f32 %v908_v7, %v208_v12  ;;  %v228_v14 = vld [vmem:[%s895_s26 + $0x188] sm:$0xff]  ;;  %v229_v15 = vld [vmem:[%s895_s26 + $0x190] sm:$0xff] }
  0x61   : > { %395 = vst [vmem:[%s938_s20 + $0xb0] sm:$0xff] %v331_v17  ;;  %v274_v27 = vmul.f32 %v908_v7, %v209_v13  ;;  %396 = vst [vmem:[%s938_s20 + $0xb8] sm:$0xff] %v332_v19  ;;  %v333_v31 = vadd.f32 %v912_v10, %v268_v20  ;;  %v334_v32 = vadd.f32 %v912_v10, %v269_v21  ;;  %v230_v16 = vld [vmem:[%s895_s26 + $0x198] sm:$0xff]  ;;  %v231_v21 = vld [vmem:[%s895_s26 + $0x1a0] sm:$0xff] }
  0x62   : > { %v335_v33 = vadd.f32 %v912_v10, %v270_v22  ;;  %v275_v34 = vmul.f32 %v908_v7, %v210_v18  ;;  %v336_v38 = vadd.f32 %v912_v10, %v271_v24  ;;  %v337_v39 = vadd.f32 %v912_v10, %v272_v25  ;;  %v232_v22 = vld [vmem:[%s895_s26 + $0x1a8] sm:$0xff] }
  0x63   : > { %v338_v40 = vadd.f32 %v912_v10, %v273_v26  ;;  %v339_v41 = vadd.f32 %v912_v10, %v274_v27  ;;  %397 = vst [vmem:[%s938_s20 + $0xc0] sm:$0xff] %v333_v31  ;;  %398 = vst [vmem:[%s938_s20 + $0xc8] sm:$0xff] %v334_v32  ;;  %v276_v44 = vmul.f32 %v908_v7, %v211_v23  ;;  %v233_v23 = vld [vmem:[%s895_s26 + $0x1b0] sm:$0xff] }
  0x64   : > { %399 = vst [vmem:[%s938_s20 + $0xd0] sm:$0xff] %v335_v33  ;;  %v340_v43 = vadd.f32 %v912_v10, %v275_v34  ;;  %v277_v45 = vmul.f32 %v908_v7, %v212_v28  ;;  %v278_v46 = vmul.f32 %v908_v7, %v213_v29  ;;  %400 = vst [vmem:[%s938_s20 + $0xd8] sm:$0xff] %v336_v38  ;;  %v234_v28 = vld [vmem:[%s895_s26 + $0x1b8] sm:$0xff]  ;;  %v235_v33 = vld [vmem:[%s895_s26 + $0x1c0] sm:$0xff] }
  0x65   : > { %401 = vst [vmem:[%s938_s20 + $0xe0] sm:$0xff] %v337_v39  ;;  %402 = vst [vmem:[%s938_s20 + $0xe8] sm:$0xff] %v338_v40  ;;  %v279_v48 = vmul.f32 %v908_v7, %v214_v30  ;;  %v280_v49 = vmul.f32 %v908_v7, %v215_v35  ;;  %v281_v50 = vmul.f32 %v908_v7, %v216_v36  ;;  %v236_v38 = vld [vmem:[%s895_s26 + $0x1c8] sm:$0xff]  ;;  %v237_v39 = vld [vmem:[%s895_s26 + $0x1d0] sm:$0xff] }
  0x66   : > { %403 = vst [vmem:[%s938_s20 + $0xf0] sm:$0xff] %v339_v41  ;;  %v282_v51 = vmul.f32 %v908_v7, %v217_v37  ;;  %404 = vst [vmem:[%s938_s20 + $0xf8] sm:$0xff] %v340_v43  ;;  %v341_v55 = vadd.f32 %v912_v10, %v276_v44  ;;  %v342_v56 = vadd.f32 %v912_v10, %v277_v45  ;;  %v238_v40 = vld [vmem:[%s895_s26 + $0x1d8] sm:$0xff]  ;;  %v239_v45 = vld [vmem:[%s895_s26 + $0x1e0] sm:$0xff] }
  0x67   : > { %v343_v57 = vadd.f32 %v912_v10, %v278_v46  ;;  %v283_v58 = vmul.f32 %v908_v7, %v218_v42  ;;  %v344_v62 = vadd.f32 %v912_v10, %v279_v48  ;;  %v345_v63 = vadd.f32 %v912_v10, %v280_v49  ;;  %v240_v46 = vld [vmem:[%s895_s26 + $0x1e8] sm:$0xff] }
  0x68   : > { %v346_v0 = vadd.f32 %v912_v10, %v281_v50  ;;  %v347_v1 = vadd.f32 %v912_v10, %v282_v51  ;;  %405 = vst [vmem:[%s938_s20 + $0x100] sm:$0xff] %v341_v55  ;;  %406 = vst [vmem:[%s938_s20 + $0x108] sm:$0xff] %v342_v56  ;;  %v284_v4 = vmul.f32 %v908_v7, %v219_v47  ;;  %v241_v47 = vld [vmem:[%s895_s26 + $0x1f0] sm:$0xff] }
  0x69   : > { %407 = vst [vmem:[%s938_s20 + $0x110] sm:$0xff] %v343_v57  ;;  %v348_v3 = vadd.f32 %v912_v10, %v283_v58  ;;  %v285_v5 = vmul.f32 %v908_v7, %v220_v52  ;;  %v286_v6 = vmul.f32 %v908_v7, %v221_v53  ;;  %408 = vst [vmem:[%s938_s20 + $0x118] sm:$0xff] %v344_v62  ;;  %v242_v52 = vld [vmem:[%s895_s26 + $0x1f8] sm:$0xff] }
  0x6a   : > { %409 = vst [vmem:[%s938_s20 + $0x120] sm:$0xff] %v345_v63  ;;  %410 = vst [vmem:[%s938_s20 + $0x128] sm:$0xff] %v346_v0  ;;  %v287_v9 = vmul.f32 %v908_v7, %v222_v54  ;;  %v288_v11 = vmul.f32 %v908_v7, %v223_v59  ;;  %v289_v12 = vmul.f32 %v908_v7, %v224_v60 }
  0x6b   : > { %411 = vst [vmem:[%s938_s20 + $0x130] sm:$0xff] %v347_v1  ;;  %v290_v13 = vmul.f32 %v908_v7, %v225_v61  ;;  %412 = vst [vmem:[%s938_s20 + $0x138] sm:$0xff] %v348_v3  ;;  %v349_v17 = vadd.f32 %v912_v10, %v284_v4  ;;  %v350_v18 = vadd.f32 %v912_v10, %v285_v5 }
  0x6c   : > { %v351_v19 = vadd.f32 %v912_v10, %v286_v6  ;;  %v291_v20 = vmul.f32 %v908_v7, %v226_v2  ;;  %v352_v24 = vadd.f32 %v912_v10, %v287_v9  ;;  %v353_v25 = vadd.f32 %v912_v10, %v288_v11 }
  0x6d   : > { %v354_v26 = vadd.f32 %v912_v10, %v289_v12  ;;  %v355_v27 = vadd.f32 %v912_v10, %v290_v13  ;;  %413 = vst [vmem:[%s938_s20 + $0x140] sm:$0xff] %v349_v17  ;;  %414 = vst [vmem:[%s938_s20 + $0x148] sm:$0xff] %v350_v18  ;;  %v292_v30 = vmul.f32 %v908_v7, %v227_v8 }
  0x6e   : > { %415 = vst [vmem:[%s938_s20 + $0x150] sm:$0xff] %v351_v19  ;;  %v356_v29 = vadd.f32 %v912_v10, %v291_v20  ;;  %v293_v31 = vmul.f32 %v908_v7, %v228_v14  ;;  %v294_v32 = vmul.f32 %v908_v7, %v229_v15  ;;  %416 = vst [vmem:[%s938_s20 + $0x158] sm:$0xff] %v352_v24 }
  0x6f   : > { %417 = vst [vmem:[%s938_s20 + $0x160] sm:$0xff] %v353_v25  ;;  %418 = vst [vmem:[%s938_s20 + $0x168] sm:$0xff] %v354_v26  ;;  %v295_v34 = vmul.f32 %v908_v7, %v230_v16  ;;  %v296_v35 = vmul.f32 %v908_v7, %v231_v21  ;;  %v297_v36 = vmul.f32 %v908_v7, %v232_v22 }
  0x70   : > { %419 = vst [vmem:[%s938_s20 + $0x170] sm:$0xff] %v355_v27  ;;  %v298_v37 = vmul.f32 %v908_v7, %v233_v23  ;;  %420 = vst [vmem:[%s938_s20 + $0x178] sm:$0xff] %v356_v29  ;;  %v357_v41 = vadd.f32 %v912_v10, %v292_v30  ;;  %v358_v42 = vadd.f32 %v912_v10, %v293_v31 }
  0x71   : > { %v359_v43 = vadd.f32 %v912_v10, %v294_v32  ;;  %v299_v44 = vmul.f32 %v908_v7, %v234_v28  ;;  %v360_v48 = vadd.f32 %v912_v10, %v295_v34  ;;  %v361_v49 = vadd.f32 %v912_v10, %v296_v35 }
  0x72   : > { %v362_v50 = vadd.f32 %v912_v10, %v297_v36  ;;  %v363_v51 = vadd.f32 %v912_v10, %v298_v37  ;;  %421 = vst [vmem:[%s938_s20 + $0x180] sm:$0xff] %v357_v41  ;;  %422 = vst [vmem:[%s938_s20 + $0x188] sm:$0xff] %v358_v42  ;;  %v300_v54 = vmul.f32 %v908_v7, %v235_v33 }
  0x73   : > { %423 = vst [vmem:[%s938_s20 + $0x190] sm:$0xff] %v359_v43  ;;  %v364_v53 = vadd.f32 %v912_v10, %v299_v44  ;;  %v301_v55 = vmul.f32 %v908_v7, %v236_v38  ;;  %v302_v56 = vmul.f32 %v908_v7, %v237_v39  ;;  %424 = vst [vmem:[%s938_s20 + $0x198] sm:$0xff] %v360_v48 }
  0x74   : > { %425 = vst [vmem:[%s938_s20 + $0x1a0] sm:$0xff] %v361_v49  ;;  %426 = vst [vmem:[%s938_s20 + $0x1a8] sm:$0xff] %v362_v50  ;;  %v303_v57 = vmul.f32 %v908_v7, %v238_v40  ;;  %v304_v58 = vmul.f32 %v908_v7, %v239_v45  ;;  %v305_v59 = vmul.f32 %v908_v7, %v240_v46 }
  0x75   : > { %427 = vst [vmem:[%s938_s20 + $0x1b0] sm:$0xff] %v363_v51  ;;  %v306_v60 = vmul.f32 %v908_v7, %v241_v47  ;;  %428 = vst [vmem:[%s938_s20 + $0x1b8] sm:$0xff] %v364_v53  ;;  %v365_v61 = vadd.f32 %v912_v10, %v300_v54  ;;  %v366_v62 = vadd.f32 %v912_v10, %v301_v55 }
  0x76   : > { %v367_v63 = vadd.f32 %v912_v10, %v302_v56  ;;  %v307_v0 = vmul.f32 %v908_v7, %v242_v52  ;;  %v368_v1 = vadd.f32 %v912_v10, %v303_v57  ;;  %v369_v2 = vadd.f32 %v912_v10, %v304_v58 }
  0x77   : > { %v370_v3 = vadd.f32 %v912_v10, %v305_v59  ;;  %v371_v4 = vadd.f32 %v912_v10, %v306_v60  ;;  %429 = vst [vmem:[%s938_s20 + $0x1c0] sm:$0xff] %v365_v61  ;;  %430 = vst [vmem:[%s938_s20 + $0x1c8] sm:$0xff] %v366_v62 }
  0x78   : > { %431 = vst [vmem:[%s938_s20 + $0x1d0] sm:$0xff] %v367_v63  ;;  %v372_v7 = vadd.f32 %v912_v10, %v307_v0  ;;  %432 = vst [vmem:[%s938_s20 + $0x1d8] sm:$0xff] %v368_v1 }
  0x79   : > { %433 = vst [vmem:[%s938_s20 + $0x1e0] sm:$0xff] %v369_v2  ;;  %434 = vst [vmem:[%s938_s20 + $0x1e8] sm:$0xff] %v370_v3 }
  0x7a   : > { %435 = vst [vmem:[%s938_s20 + $0x1f0] sm:$0xff] %v371_v4  ;;  %436 = vst [vmem:[%s938_s20 + $0x1f8] sm:$0xff] %v372_v7 }
  0x7b   : > { %677 = shalt.err (!%p674_p6)
}
  0x7c   : > { %s678_s14 = scalar_lea.hbm %s1161_s5, 8192  ;;  %s682_s3 = scalar_lea.hbm %s1217_s2, 32768 }
  0x7d   : > { %p679_p7 = scmp.ne.s32.totalorder %s1161_s5, %s678_s14  ;;  %p683_p4 = scmp.lt.u32.totalorder %s1161_s5, %s1217_s2 }
  0x7e   : > { %p684_p2 = scmp.lt.u32.totalorder %s682_s3, %s678_s14  ;;  %p686_p12 = scmp.lt.u32.totalorder %s678_s14, %s1161_s5 }
  0x7f   : > { %p680_p8 = pnand %p679_p7, %p1230_p13 }
  0x80   : > { %p685_p11 = por %p684_p2, %p683_p4 }
  0x81   : > { %p681_p9 = pneg %p680_p8 }
  0x82   : > { %p687_p0 = por %p686_p12, %p685_p11 }
  0x84   : > { %p688_p3 = pnand %p687_p0, %p681_p9 }
  0x86   : > { %691 = shalt.err (!%p688_p3)
}
  0x87   : > { %s741_s23 = smov 1024   ;;  %s742_s19 = smov 64  }
  0x88   : > { %566 = dma.vmem_to_hbm [thread:$0]  (%p1230_p13), %s1163_s30, 8192, %s1161_s5, %s438_s6, %s741_s23, %s741_s23, %s742_s19  }
  0x89 PF: > { %p583_p10 = scmp.ge.s32.totalorder %s734_s12, 2  ;;  %s467_s20 = sand.u32 1, %s722_s9  }
  0x8a   : > { %p1231_p5 = scmp.ne.s32.totalorder %s1224_s22, 0  ;;  %s468_s29 = scalar_lea.sflag [#allocation4], %s467_s20 }
  0x8c   : > { %p577_p1 = pnand %p583_p10, %p1231_p5 }
  0x8e   : > { %717 = dma.done.wait (!%p577_p1), %s468_s29, 8192  }
  0x8f   : > { %719 = vsyncadd (!%p577_p1), %s468_s29, 4294959104  ;;  %p16_p6 = scmp.ge.s32.totalorder %s783_s15, 6   ;;  %s1232_s9 = smov %s726_s10 }
  0x90   : > { %s1233_s10 = smov %s730_s11  ;;  %s1234_s11 = smov %s795_s18 }
  0x91   : > { %s1235_s12 = smov %s783_s15  ;;  %18 = sbr.rel (!%p16_p6) target bundleno = 6 (0x6), region = 78 }
  0x98   :  { %473 = vsyncpa [#allocation3], 1 }
  0x99   :  { %475 = vsyncpa [#allocation3 + $0x1], 1 }
  0x9a   :  { %476 = vsyncpa [#allocation4], 1 }
  0x9b   :  { %478 = vsyncpa [#allocation4 + $0x1], 1 }
  0x9c   :  { %479 = vsyncpa [#allocation5], 1 }
  0x9d   :  { %481 = vsyncpa [#allocation5 + $0x1], 1 }

</bundles_post_ra>
